<compile_context>
chip_gen: v7x
topology: tpu7x:2x2x1
jax: 0.10.0
libtpu: 0.0.40
codegen_flags: <defaults>
</compile_context>

<pallas_src>
import functools

import jax
import jax.numpy as jnp
from jax import lax
from jax.experimental import pallas as pl
from jax.experimental.pallas import tpu as pltpu

_EPS = 1e-5  # torch.nn.InstanceNorm1d default eps (module uses affine=True)


# --------------------------------- kernel -----------------------------------

def _residual_kernel(x_ref, par_ref, o_ref, *, c_in, c_out, k_size, pad,
                     bsz, length):
    bl = bsz * length
    kc_in, kc_out = k_size * c_in, k_size * c_out

    x = x_ref[...].astype(jnp.float32)                         # (C_in, B*L)

    # ---- packed parameters (single slab, resident across grid steps) ----
    w1 = par_ref[0:c_out, 0:kc_in]                             # (C_out, K*C_in)
    w2 = par_ref[0:c_out, kc_in:2 * kc_in]                     # (C_out, K*C_in)
    w3 = par_ref[0:c_in, 2 * kc_in:2 * kc_in + kc_out]         # (C_in,  K*C_out)
    og = 2 * kc_in + kc_out
    g1, t1 = par_ref[0:c_out, og + 0:og + 1], par_ref[0:c_out, og + 1:og + 2]
    g2, t2 = par_ref[0:c_out, og + 2:og + 3], par_ref[0:c_out, og + 3:og + 4]
    g3, t3 = par_ref[0:c_in, og + 4:og + 5], par_ref[0:c_in, og + 5:og + 6]

    # Position of each folded column within its own sample; boundary masks for
    # the shifted taps (computed once, reused by all three convs).
    pos = lax.broadcasted_iota(jnp.int32, (1, bl), 1) % length
    keep = {}
    for k in range(k_size):
        d = k - pad
        if d < 0:
            keep[d] = pos >= -d
        elif d > 0:
            keep[d] = pos < length - d

    def conv_same(h, w):
        """'same' Conv1d (bias-free) as ONE MXU matmul over stacked taps."""
        taps = []
        for k in range(k_size):
            d = k - pad
            if d == 0:
                taps.append(h)
            else:
                # roll rides the XLU; the mask zeroes columns that would read
                # past a sample boundary (i.e. the implicit zero padding).
                shifted = pltpu.roll(h, shift=(-d) % bl, axis=1)
                taps.append(jnp.where(keep[d], shifted, 0.0))
        stacked = jnp.concatenate(taps, axis=0)                 # (K*C, B*L)
        return jnp.dot(w, stacked, preferred_element_type=jnp.float32,
                       precision=lax.Precision.HIGHEST)

    def inst_norm(h, gamma, beta):
        """Per-sample InstanceNorm1d; stats on tile-aligned (C, L) slices."""
        segs = []
        for n in range(bsz):  # static unroll over samples in this block
            hs = h[:, n * length:(n + 1) * length]
            mean = jnp.mean(hs, axis=-1, keepdims=True)
            ex2 = jnp.mean(hs * hs, axis=-1, keepdims=True)
            scale = gamma * lax.rsqrt(ex2 - mean * mean + _EPS)
            segs.append(hs * scale + (beta - mean * scale))
        return segs[0] if bsz == 1 else jnp.concatenate(segs, axis=-1)

    h1 = inst_norm(conv_same(x, w1), g1, t1)
    hg = inst_norm(conv_same(x, w2), g2, t2)
    glu = h1 * jax.nn.sigmoid(hg)
    h2 = inst_norm(conv_same(glu, w3), g3, t3)

    o_ref[...] = (x + h2).astype(o_ref.dtype)


# --------------------------------- wrapper ----------------------------------

def residual_layer_forward(x, params, *, padding, batch_block=None):
    """x: (N, C_in, L) float32.  params[layer] = (weight, bias, gamma, beta).

    Conv biases are accepted (mirrors the nn.Module state) but intentionally
    not passed to the kernel: the following InstanceNorm removes any
    per-channel constant, so the result is unchanged.
    """
    n, c_in, length = x.shape
    w1, _b1, g1, t1 = params["conv1d_layer"]
    w2, _b2, g2, t2 = params["conv_layer_gates"]
    w3, _b3, g3, t3 = params["conv1d_out_layer"]
    c_out, _, k_size = w1.shape
    # Residual add requires length-preserving ('same') convs with stride=1.
    assert 2 * padding == k_size - 1, "ResidualLayer needs length-preserving convs"

    bsz = n if batch_block is None else batch_block
    assert n % bsz == 0, "batch_block must divide the batch size"

    cmax = max(c_in, c_out)
    kc_in, kc_out = k_size * c_in, k_size * c_out

    def taps_matrix(w):  # (C_out, C_in, K) -> (C_out, K*C_in): tap-major columns
        co, ci, k = w.shape
        return jnp.transpose(w, (0, 2, 1)).reshape(co, k * ci)

    def rows(a):         # pad the channel (sublane) axis up to cmax
        return jnp.pad(a, ((0, cmax - a.shape[0]), (0, 0)))

    col = lambda v: v.reshape(-1, 1)
    # One packed parameter slab: [W1 | W2 | W3 | g1 t1 g2 t2 g3 t3]
    pars = jnp.concatenate(
        [rows(taps_matrix(w1)), rows(taps_matrix(w2)), rows(taps_matrix(w3)),
         rows(col(g1)), rows(col(t1)), rows(col(g2)), rows(col(t2)),
         rows(col(g3)), rows(col(t3))],
        axis=1).astype(jnp.float32)            # (cmax, 2*K*C_in + K*C_out + 6)

    # Fold batch into the lane axis: (N, C, L) -> (C, N*L).  Pure layout
    # plumbing in the wrapper; keeps every kernel load/store lane-dense.
    x_folded = jnp.transpose(x, (1, 0, 2)).reshape(c_in, n * length)

    kernel = functools.partial(_residual_kernel, c_in=c_in, c_out=c_out,
                               k_size=k_size, pad=padding, bsz=bsz,
                               length=length)

    out_folded = pl.pallas_call(
        kernel,
        out_shape=jax.ShapeDtypeStruct((c_in, n * length), x.dtype),
        grid=(n // bsz,),
        in_specs=[
            pl.BlockSpec((c_in, bsz * length), lambda i: (0, i)),
            pl.BlockSpec(pars.shape, lambda i: (0, 0)),   # params stay resident
        ],
        out_specs=pl.BlockSpec((c_in, bsz * length), lambda i: (0, i)),
        compiler_params=pltpu.CompilerParams(
            dimension_semantics=("parallel",),  # batch blocks are independent
        ),
    )(x_folded, pars)

    return out_folded.reshape(c_in, n, length).transpose(1, 0, 2)


# ----------------------------- plain-JAX reference ---------------------------

def _reference_forward(x, params, padding):
    def conv1d(h, w, b):
        y = lax.conv_general_dilated(
            h, w, window_strides=(1,), padding=[(padding, padding)],
            dimension_numbers=("NCH", "OIH", "NCH"),
            precision=lax.Precision.HIGHEST)
        return y + b[None, :, None]

    def inorm(h, g, t):
        m = jnp.mean(h, axis=-1, keepdims=True)
        v = jnp.mean((h - m) ** 2, axis=-1, keepdims=True)
        return g[None, :, None] * ((h - m) / jnp.sqrt(v + _EPS)) + t[None, :, None]

    w1, b1, g1, t1 = params["conv1d_layer"]
    w2, b2, g2, t2 = params["conv_layer_gates"]
    w3, b3, g3, t3 = params["conv1d_out_layer"]
    h1 = inorm(conv1d(x, w1, b1), g1, t1)
    hg = inorm(conv1d(x, w2, b2), g2, t2)
    glu = h1 * jax.nn.sigmoid(hg)
    h2 = inorm(conv1d(glu, w3, b3), g3, t3)
    return x + h2


# ---------------------------------- main -------------------------------------

if __name__ == "__main__":
    # Conv1d layout (N, C, L).  L=128 keeps the last dim lane-dense; the whole
    # batch (B=N=2) is processed in one grid step as a (C, 256)-wide slab.
    N, C_IN, C_OUT, LENGTH, K, PAD = 2, 8, 16, 128, 3, 1

    key = jax.random.PRNGKey(0)
    kx, *kp = jax.random.split(key, 13)
    x = jax.random.normal(kx, (N, C_IN, LENGTH), dtype=jnp.float32)

    def make_layer(kw, kb, kg, kt, c_out, c_in):
        fan_in = c_in * K
        w = jax.random.normal(kw, (c_out, c_in, K), jnp.float32) / (fan_in ** 0.5)
        b = 0.1 * jax.random.normal(kb, (c_out,), jnp.float32)
        gamma = 1.0 + 0.1 * jax.random.normal(kg, (c_out,), jnp.float32)
        beta = 0.1 * jax.random.normal(kt, (c_out,), jnp.float32)
        return (w, b, gamma, beta)

    params = {
        "conv1d_layer":     make_layer(kp[0], kp[1], kp[2],  kp[3],  C_OUT, C_IN),
        "conv_layer_gates": make_layer(kp[4], kp[5], kp[6],  kp[7],  C_OUT, C_IN),
        "conv1d_out_layer": make_layer(kp[8], kp[9], kp[10], kp[11], C_IN,  C_OUT),
    }

    out = jax.block_until_ready(residual_layer_forward(x, params, padding=PAD))

    ref = _reference_forward(x, params, PAD)
    assert out.shape == x.shape and out.dtype == x.dtype
    # All-f32 path with full-precision MXU contraction: tightened tolerance
    # (was 1e-2) so tap-merge / mask / bias-cancellation bugs are caught.
    max_err = float(jnp.max(jnp.abs(out - ref)))
    assert max_err < 5e-4, f"max abs error {max_err}"
    print("KERNEL_OK")
</pallas_src>

<mosaic_0001>
module attributes {stable_mosaic.version = 11 : i64} {
  func.func @_residual_kernel(%arg0: i32, %arg1: memref<8x256xf32, #tpu.memory_space<vmem>>, %arg2: memref<16x102xf32, #tpu.memory_space<vmem>>, %arg3: memref<8x256xf32, #tpu.memory_space<vmem>>) attributes {dimension_semantics = [#tpu.dimension_semantics<parallel>], iteration_bounds = array<i64: 1>, scalar_prefetch = 0 : i64, scratch_operands = 0 : i64, tpu.core_type = #tpu.core_type<tc>, window_params = [{transform_indices = @transform_0, window_bounds = array<i64: 8, 256>}, {pipeline_mode = #tpu.pipeline_mode<synchronous>, transform_indices = @transform_1, window_bounds = array<i64: 16, 102>}, {transform_indices = @transform_2, window_bounds = array<i64: 8, 256>}]} {
    %c0 = arith.constant 0 : index
    %c0_0 = arith.constant 0 : index
    %0 = vector.load %arg1[%c0, %c0_0] : memref<8x256xf32, #tpu.memory_space<vmem>>, vector<8x256xf32>
    %c0_1 = arith.constant 0 : index
    %c0_2 = arith.constant 0 : index
    %1 = vector.load %arg2[%c0_1, %c0_2] : memref<16x102xf32, #tpu.memory_space<vmem>>, vector<16x24xf32>
    %c0_3 = arith.constant 0 : index
    %c24 = arith.constant 24 : index
    %2 = vector.load %arg2[%c0_3, %c24] : memref<16x102xf32, #tpu.memory_space<vmem>>, vector<16x24xf32>
    %c0_4 = arith.constant 0 : index
    %c48 = arith.constant 48 : index
    %3 = vector.load %arg2[%c0_4, %c48] : memref<16x102xf32, #tpu.memory_space<vmem>>, vector<8x48xf32>
    %c0_5 = arith.constant 0 : index
    %c96 = arith.constant 96 : index
    %4 = vector.load %arg2[%c0_5, %c96] : memref<16x102xf32, #tpu.memory_space<vmem>>, vector<16x1xf32>
    %c0_6 = arith.constant 0 : index
    %c97 = arith.constant 97 : index
    %5 = vector.load %arg2[%c0_6, %c97] : memref<16x102xf32, #tpu.memory_space<vmem>>, vector<16x1xf32>
    %c0_7 = arith.constant 0 : index
    %c98 = arith.constant 98 : index
    %6 = vector.load %arg2[%c0_7, %c98] : memref<16x102xf32, #tpu.memory_space<vmem>>, vector<16x1xf32>
    %c0_8 = arith.constant 0 : index
    %c99 = arith.constant 99 : index
    %7 = vector.load %arg2[%c0_8, %c99] : memref<16x102xf32, #tpu.memory_space<vmem>>, vector<16x1xf32>
    %c0_9 = arith.constant 0 : index
    %c100 = arith.constant 100 : index
    %8 = vector.load %arg2[%c0_9, %c100] : memref<16x102xf32, #tpu.memory_space<vmem>>, vector<8x1xf32>
    %c0_10 = arith.constant 0 : index
    %c101 = arith.constant 101 : index
    %9 = vector.load %arg2[%c0_10, %c101] : memref<16x102xf32, #tpu.memory_space<vmem>>, vector<8x1xf32>
    %10 = tpu.iota {dimensions = array<i32: 1>} : vector<1x256xi32>
    %c128_i32 = arith.constant 128 : i32
    %c0_i32 = arith.constant 0 : i32
    %11 = arith.cmpi eq, %c128_i32, %c0_i32 : i32
    %c1_i32 = arith.constant 1 : i32
    %12 = arith.select %11, %c1_i32, %c128_i32 : i32
    %13 = vector.broadcast %12 : i32 to vector<1x256xi32>
    %14 = arith.remsi %10, %13 : vector<1x256xi32>
    %c0_i32_11 = arith.constant 0 : i32
    %15 = vector.broadcast %c0_i32_11 : i32 to vector<1x256xi32>
    %16 = arith.cmpi ne, %14, %15 : vector<1x256xi32>
    %c0_i32_12 = arith.constant 0 : i32
    %17 = vector.broadcast %c0_i32_12 : i32 to vector<1x256xi32>
    %18 = arith.cmpi slt, %14, %17 : vector<1x256xi32>
    %c0_i32_13 = arith.constant 0 : i32
    %19 = arith.cmpi slt, %12, %c0_i32_13 : i32
    %20 = vector.broadcast %19 : i1 to vector<1x256xi1>
    %21 = vector.broadcast %20 : vector<1x256xi1> to vector<1x256xi1>
    %22 = arith.xori %18, %21 : vector<1x256xi1>
    %23 = arith.andi %22, %16 : vector<1x256xi1>
    %24 = vector.broadcast %12 : i32 to vector<1x256xi32>
    %25 = arith.addi %14, %24 : vector<1x256xi32>
    %26 = arith.select %23, %25, %14 : vector<1x256xi1>, vector<1x256xi32>
    %c1_i32_14 = arith.constant 1 : i32
    %27 = vector.broadcast %c1_i32_14 : i32 to vector<1x256xi32>
    %28 = arith.cmpi sge, %26, %27 : vector<1x256xi32>
    %c127_i32 = arith.constant 127 : i32
    %29 = vector.broadcast %c127_i32 : i32 to vector<1x256xi32>
    %30 = arith.cmpi slt, %26, %29 : vector<1x256xi32>
    %c1_i32_15 = arith.constant 1 : i32
    %31 = tpu.dynamic_rotate %0 by %c1_i32_15 dim 1 : vector<8x256xf32>, i32 -> vector<8x256xf32>
    %cst = arith.constant 0.000000e+00 : f32
    %32 = vector.shape_cast %28 : vector<1x256xi1> to vector<1x256xi1>
    %33 = vector.broadcast %32 : vector<1x256xi1> to vector<8x256xi1>
    %34 = vector.broadcast %cst : f32 to vector<8x256xf32>
    %35 = arith.select %33, %31, %34 : vector<8x256xi1>, vector<8x256xf32>
    %c255_i32 = arith.constant 255 : i32
    %36 = tpu.dynamic_rotate %0 by %c255_i32 dim 1 : vector<8x256xf32>, i32 -> vector<8x256xf32>
    %cst_16 = arith.constant 0.000000e+00 : f32
    %37 = vector.shape_cast %30 : vector<1x256xi1> to vector<1x256xi1>
    %38 = vector.broadcast %37 : vector<1x256xi1> to vector<8x256xi1>
    %39 = vector.broadcast %cst_16 : f32 to vector<8x256xf32>
    %40 = arith.select %38, %36, %39 : vector<8x256xi1>, vector<8x256xf32>
    %41 = tpu.concatenate %35, %0, %40 in 0 : vector<8x256xf32>, vector<8x256xf32>, vector<8x256xf32> -> vector<24x256xf32>
    %cst_17 = arith.constant dense<0.000000e+00> : vector<16x256xf32>
    %42 = tpu.matmul %1, %41, %cst_17 {dimension_numbers = #tpu.dot_dimension_numbers<[1], [0], [0], [1], [0, 0, 1, 1], [], []>, precision = #tpu.contract_precision<fp32>} : vector<16x24xf32>, vector<24x256xf32>, vector<16x256xf32> -> vector<16x256xf32>
    %43 = vector.extract_strided_slice %42 {offsets = [0, 0], sizes = [16, 128], strides = [1, 1]} : vector<16x256xf32> to vector<16x128xf32>
    %cst_18 = arith.constant dense<0.000000e+00> : vector<16xf32>
    %44 = vector.multi_reduction <add>, %43, %cst_18 [1] : vector<16x128xf32> to vector<16xf32>
    %45 = vector.shape_cast %44 : vector<16xf32> to vector<16x1xf32>
    %cst_19 = arith.constant 1.280000e+02 : f32
    %46 = vector.broadcast %cst_19 : f32 to vector<16x1xf32>
    %47 = arith.divf %45, %46 : vector<16x1xf32>
    %48 = arith.mulf %43, %43 : vector<16x128xf32>
    %cst_20 = arith.constant dense<0.000000e+00> : vector<16xf32>
    %49 = vector.multi_reduction <add>, %48, %cst_20 [1] : vector<16x128xf32> to vector<16xf32>
    %50 = vector.shape_cast %49 : vector<16xf32> to vector<16x1xf32>
    %cst_21 = arith.constant 1.280000e+02 : f32
    %51 = vector.broadcast %cst_21 : f32 to vector<16x1xf32>
    %52 = arith.divf %50, %51 : vector<16x1xf32>
    %53 = arith.mulf %47, %47 : vector<16x1xf32>
    %54 = arith.subf %52, %53 : vector<16x1xf32>
    %cst_22 = arith.constant 9.99999974E-6 : f32
    %55 = vector.broadcast %cst_22 : f32 to vector<16x1xf32>
    %56 = arith.addf %54, %55 : vector<16x1xf32>
    %57 = math.rsqrt %56 : vector<16x1xf32>
    %58 = arith.mulf %4, %57 : vector<16x1xf32>
    %59 = vector.broadcast %58 : vector<16x1xf32> to vector<16x128xf32>
    %60 = arith.mulf %43, %59 : vector<16x128xf32>
    %61 = arith.mulf %47, %58 : vector<16x1xf32>
    %62 = arith.subf %5, %61 : vector<16x1xf32>
    %63 = vector.broadcast %62 : vector<16x1xf32> to vector<16x128xf32>
    %64 = arith.addf %60, %63 : vector<16x128xf32>
    %65 = vector.extract_strided_slice %42 {offsets = [0, 128], sizes = [16, 128], strides = [1, 1]} : vector<16x256xf32> to vector<16x128xf32>
    %cst_23 = arith.constant dense<0.000000e+00> : vector<16xf32>
    %66 = vector.multi_reduction <add>, %65, %cst_23 [1] : vector<16x128xf32> to vector<16xf32>
    %67 = vector.shape_cast %66 : vector<16xf32> to vector<16x1xf32>
    %cst_24 = arith.constant 1.280000e+02 : f32
    %68 = vector.broadcast %cst_24 : f32 to vector<16x1xf32>
    %69 = arith.divf %67, %68 : vector<16x1xf32>
    %70 = arith.mulf %65, %65 : vector<16x128xf32>
    %cst_25 = arith.constant dense<0.000000e+00> : vector<16xf32>
    %71 = vector.multi_reduction <add>, %70, %cst_25 [1] : vector<16x128xf32> to vector<16xf32>
    %72 = vector.shape_cast %71 : vector<16xf32> to vector<16x1xf32>
    %cst_26 = arith.constant 1.280000e+02 : f32
    %73 = vector.broadcast %cst_26 : f32 to vector<16x1xf32>
    %74 = arith.divf %72, %73 : vector<16x1xf32>
    %75 = arith.mulf %69, %69 : vector<16x1xf32>
    %76 = arith.subf %74, %75 : vector<16x1xf32>
    %cst_27 = arith.constant 9.99999974E-6 : f32
    %77 = vector.broadcast %cst_27 : f32 to vector<16x1xf32>
    %78 = arith.addf %76, %77 : vector<16x1xf32>
    %79 = math.rsqrt %78 : vector<16x1xf32>
    %80 = arith.mulf %4, %79 : vector<16x1xf32>
    %81 = vector.broadcast %80 : vector<16x1xf32> to vector<16x128xf32>
    %82 = arith.mulf %65, %81 : vector<16x128xf32>
    %83 = arith.mulf %69, %80 : vector<16x1xf32>
    %84 = arith.subf %5, %83 : vector<16x1xf32>
    %85 = vector.broadcast %84 : vector<16x1xf32> to vector<16x128xf32>
    %86 = arith.addf %82, %85 : vector<16x128xf32>
    %87 = tpu.concatenate %64, %86 in 1 : vector<16x128xf32>, vector<16x128xf32> -> vector<16x256xf32>
    %c1_i32_28 = arith.constant 1 : i32
    %88 = tpu.dynamic_rotate %0 by %c1_i32_28 dim 1 : vector<8x256xf32>, i32 -> vector<8x256xf32>
    %cst_29 = arith.constant 0.000000e+00 : f32
    %89 = vector.shape_cast %28 : vector<1x256xi1> to vector<1x256xi1>
    %90 = vector.broadcast %89 : vector<1x256xi1> to vector<8x256xi1>
    %91 = vector.broadcast %cst_29 : f32 to vector<8x256xf32>
    %92 = arith.select %90, %88, %91 : vector<8x256xi1>, vector<8x256xf32>
    %c255_i32_30 = arith.constant 255 : i32
    %93 = tpu.dynamic_rotate %0 by %c255_i32_30 dim 1 : vector<8x256xf32>, i32 -> vector<8x256xf32>
    %cst_31 = arith.constant 0.000000e+00 : f32
    %94 = vector.shape_cast %30 : vector<1x256xi1> to vector<1x256xi1>
    %95 = vector.broadcast %94 : vector<1x256xi1> to vector<8x256xi1>
    %96 = vector.broadcast %cst_31 : f32 to vector<8x256xf32>
    %97 = arith.select %95, %93, %96 : vector<8x256xi1>, vector<8x256xf32>
    %98 = tpu.concatenate %92, %0, %97 in 0 : vector<8x256xf32>, vector<8x256xf32>, vector<8x256xf32> -> vector<24x256xf32>
    %cst_32 = arith.constant dense<0.000000e+00> : vector<16x256xf32>
    %99 = tpu.matmul %2, %98, %cst_32 {dimension_numbers = #tpu.dot_dimension_numbers<[1], [0], [0], [1], [0, 0, 1, 1], [], []>, precision = #tpu.contract_precision<fp32>} : vector<16x24xf32>, vector<24x256xf32>, vector<16x256xf32> -> vector<16x256xf32>
    %100 = vector.extract_strided_slice %99 {offsets = [0, 0], sizes = [16, 128], strides = [1, 1]} : vector<16x256xf32> to vector<16x128xf32>
    %cst_33 = arith.constant dense<0.000000e+00> : vector<16xf32>
    %101 = vector.multi_reduction <add>, %100, %cst_33 [1] : vector<16x128xf32> to vector<16xf32>
    %102 = vector.shape_cast %101 : vector<16xf32> to vector<16x1xf32>
    %cst_34 = arith.constant 1.280000e+02 : f32
    %103 = vector.broadcast %cst_34 : f32 to vector<16x1xf32>
    %104 = arith.divf %102, %103 : vector<16x1xf32>
    %105 = arith.mulf %100, %100 : vector<16x128xf32>
    %cst_35 = arith.constant dense<0.000000e+00> : vector<16xf32>
    %106 = vector.multi_reduction <add>, %105, %cst_35 [1] : vector<16x128xf32> to vector<16xf32>
    %107 = vector.shape_cast %106 : vector<16xf32> to vector<16x1xf32>
    %cst_36 = arith.constant 1.280000e+02 : f32
    %108 = vector.broadcast %cst_36 : f32 to vector<16x1xf32>
    %109 = arith.divf %107, %108 : vector<16x1xf32>
    %110 = arith.mulf %104, %104 : vector<16x1xf32>
    %111 = arith.subf %109, %110 : vector<16x1xf32>
    %cst_37 = arith.constant 9.99999974E-6 : f32
    %112 = vector.broadcast %cst_37 : f32 to vector<16x1xf32>
    %113 = arith.addf %111, %112 : vector<16x1xf32>
    %114 = math.rsqrt %113 : vector<16x1xf32>
    %115 = arith.mulf %6, %114 : vector<16x1xf32>
    %116 = vector.broadcast %115 : vector<16x1xf32> to vector<16x128xf32>
    %117 = arith.mulf %100, %116 : vector<16x128xf32>
    %118 = arith.mulf %104, %115 : vector<16x1xf32>
    %119 = arith.subf %7, %118 : vector<16x1xf32>
    %120 = vector.broadcast %119 : vector<16x1xf32> to vector<16x128xf32>
    %121 = arith.addf %117, %120 : vector<16x128xf32>
    %122 = vector.extract_strided_slice %99 {offsets = [0, 128], sizes = [16, 128], strides = [1, 1]} : vector<16x256xf32> to vector<16x128xf32>
    %cst_38 = arith.constant dense<0.000000e+00> : vector<16xf32>
    %123 = vector.multi_reduction <add>, %122, %cst_38 [1] : vector<16x128xf32> to vector<16xf32>
    %124 = vector.shape_cast %123 : vector<16xf32> to vector<16x1xf32>
    %cst_39 = arith.constant 1.280000e+02 : f32
    %125 = vector.broadcast %cst_39 : f32 to vector<16x1xf32>
    %126 = arith.divf %124, %125 : vector<16x1xf32>
    %127 = arith.mulf %122, %122 : vector<16x128xf32>
    %cst_40 = arith.constant dense<0.000000e+00> : vector<16xf32>
    %128 = vector.multi_reduction <add>, %127, %cst_40 [1] : vector<16x128xf32> to vector<16xf32>
    %129 = vector.shape_cast %128 : vector<16xf32> to vector<16x1xf32>
    %cst_41 = arith.constant 1.280000e+02 : f32
    %130 = vector.broadcast %cst_41 : f32 to vector<16x1xf32>
    %131 = arith.divf %129, %130 : vector<16x1xf32>
    %132 = arith.mulf %126, %126 : vector<16x1xf32>
    %133 = arith.subf %131, %132 : vector<16x1xf32>
    %cst_42 = arith.constant 9.99999974E-6 : f32
    %134 = vector.broadcast %cst_42 : f32 to vector<16x1xf32>
    %135 = arith.addf %133, %134 : vector<16x1xf32>
    %136 = math.rsqrt %135 : vector<16x1xf32>
    %137 = arith.mulf %6, %136 : vector<16x1xf32>
    %138 = vector.broadcast %137 : vector<16x1xf32> to vector<16x128xf32>
    %139 = arith.mulf %122, %138 : vector<16x128xf32>
    %140 = arith.mulf %126, %137 : vector<16x1xf32>
    %141 = arith.subf %7, %140 : vector<16x1xf32>
    %142 = vector.broadcast %141 : vector<16x1xf32> to vector<16x128xf32>
    %143 = arith.addf %139, %142 : vector<16x128xf32>
    %144 = tpu.concatenate %121, %143 in 1 : vector<16x128xf32>, vector<16x128xf32> -> vector<16x256xf32>
    %145 = arith.negf %144 : vector<16x256xf32>
    %146 = math.exp %145 : vector<16x256xf32>
    %cst_43 = arith.constant 1.000000e+00 : f32
    %147 = vector.broadcast %cst_43 : f32 to vector<16x256xf32>
    %148 = arith.addf %147, %146 : vector<16x256xf32>
    %149 = arith.divf %147, %148 : vector<16x256xf32>
    %150 = arith.mulf %87, %149 : vector<16x256xf32>
    %c1_i32_44 = arith.constant 1 : i32
    %151 = tpu.dynamic_rotate %150 by %c1_i32_44 dim 1 : vector<16x256xf32>, i32 -> vector<16x256xf32>
    %cst_45 = arith.constant 0.000000e+00 : f32
    %152 = vector.shape_cast %28 : vector<1x256xi1> to vector<1x256xi1>
    %153 = vector.broadcast %152 : vector<1x256xi1> to vector<16x256xi1>
    %154 = vector.broadcast %cst_45 : f32 to vector<16x256xf32>
    %155 = arith.select %153, %151, %154 : vector<16x256xi1>, vector<16x256xf32>
    %c255_i32_46 = arith.constant 255 : i32
    %156 = tpu.dynamic_rotate %150 by %c255_i32_46 dim 1 : vector<16x256xf32>, i32 -> vector<16x256xf32>
    %cst_47 = arith.constant 0.000000e+00 : f32
    %157 = vector.shape_cast %30 : vector<1x256xi1> to vector<1x256xi1>
    %158 = vector.broadcast %157 : vector<1x256xi1> to vector<16x256xi1>
    %159 = vector.broadcast %cst_47 : f32 to vector<16x256xf32>
    %160 = arith.select %158, %156, %159 : vector<16x256xi1>, vector<16x256xf32>
    %161 = tpu.concatenate %155, %150, %160 in 0 : vector<16x256xf32>, vector<16x256xf32>, vector<16x256xf32> -> vector<48x256xf32>
    %cst_48 = arith.constant dense<0.000000e+00> : vector<8x256xf32>
    %162 = tpu.matmul %3, %161, %cst_48 {dimension_numbers = #tpu.dot_dimension_numbers<[1], [0], [0], [1], [0, 0, 1, 1], [], []>, precision = #tpu.contract_precision<fp32>} : vector<8x48xf32>, vector<48x256xf32>, vector<8x256xf32> -> vector<8x256xf32>
    %163 = vector.extract_strided_slice %162 {offsets = [0, 0], sizes = [8, 128], strides = [1, 1]} : vector<8x256xf32> to vector<8x128xf32>
    %cst_49 = arith.constant dense<0.000000e+00> : vector<8xf32>
    %164 = vector.multi_reduction <add>, %163, %cst_49 [1] : vector<8x128xf32> to vector<8xf32>
    %165 = vector.shape_cast %164 : vector<8xf32> to vector<8x1xf32>
    %cst_50 = arith.constant 1.280000e+02 : f32
    %166 = vector.broadcast %cst_50 : f32 to vector<8x1xf32>
    %167 = arith.divf %165, %166 : vector<8x1xf32>
    %168 = arith.mulf %163, %163 : vector<8x128xf32>
    %cst_51 = arith.constant dense<0.000000e+00> : vector<8xf32>
    %169 = vector.multi_reduction <add>, %168, %cst_51 [1] : vector<8x128xf32> to vector<8xf32>
    %170 = vector.shape_cast %169 : vector<8xf32> to vector<8x1xf32>
    %cst_52 = arith.constant 1.280000e+02 : f32
    %171 = vector.broadcast %cst_52 : f32 to vector<8x1xf32>
    %172 = arith.divf %170, %171 : vector<8x1xf32>
    %173 = arith.mulf %167, %167 : vector<8x1xf32>
    %174 = arith.subf %172, %173 : vector<8x1xf32>
    %cst_53 = arith.constant 9.99999974E-6 : f32
    %175 = vector.broadcast %cst_53 : f32 to vector<8x1xf32>
    %176 = arith.addf %174, %175 : vector<8x1xf32>
    %177 = math.rsqrt %176 : vector<8x1xf32>
    %178 = arith.mulf %8, %177 : vector<8x1xf32>
    %179 = vector.broadcast %178 : vector<8x1xf32> to vector<8x128xf32>
    %180 = arith.mulf %163, %179 : vector<8x128xf32>
    %181 = arith.mulf %167, %178 : vector<8x1xf32>
    %182 = arith.subf %9, %181 : vector<8x1xf32>
    %183 = vector.broadcast %182 : vector<8x1xf32> to vector<8x128xf32>
    %184 = arith.addf %180, %183 : vector<8x128xf32>
    %185 = vector.extract_strided_slice %162 {offsets = [0, 128], sizes = [8, 128], strides = [1, 1]} : vector<8x256xf32> to vector<8x128xf32>
    %cst_54 = arith.constant dense<0.000000e+00> : vector<8xf32>
    %186 = vector.multi_reduction <add>, %185, %cst_54 [1] : vector<8x128xf32> to vector<8xf32>
    %187 = vector.shape_cast %186 : vector<8xf32> to vector<8x1xf32>
    %cst_55 = arith.constant 1.280000e+02 : f32
    %188 = vector.broadcast %cst_55 : f32 to vector<8x1xf32>
    %189 = arith.divf %187, %188 : vector<8x1xf32>
    %190 = arith.mulf %185, %185 : vector<8x128xf32>
    %cst_56 = arith.constant dense<0.000000e+00> : vector<8xf32>
    %191 = vector.multi_reduction <add>, %190, %cst_56 [1] : vector<8x128xf32> to vector<8xf32>
    %192 = vector.shape_cast %191 : vector<8xf32> to vector<8x1xf32>
    %cst_57 = arith.constant 1.280000e+02 : f32
    %193 = vector.broadcast %cst_57 : f32 to vector<8x1xf32>
    %194 = arith.divf %192, %193 : vector<8x1xf32>
    %195 = arith.mulf %189, %189 : vector<8x1xf32>
    %196 = arith.subf %194, %195 : vector<8x1xf32>
    %cst_58 = arith.constant 9.99999974E-6 : f32
    %197 = vector.broadcast %cst_58 : f32 to vector<8x1xf32>
    %198 = arith.addf %196, %197 : vector<8x1xf32>
    %199 = math.rsqrt %198 : vector<8x1xf32>
    %200 = arith.mulf %8, %199 : vector<8x1xf32>
    %201 = vector.broadcast %200 : vector<8x1xf32> to vector<8x128xf32>
    %202 = arith.mulf %185, %201 : vector<8x128xf32>
    %203 = arith.mulf %189, %200 : vector<8x1xf32>
    %204 = arith.subf %9, %203 : vector<8x1xf32>
    %205 = vector.broadcast %204 : vector<8x1xf32> to vector<8x128xf32>
    %206 = arith.addf %202, %205 : vector<8x128xf32>
    %207 = tpu.concatenate %184, %206 in 1 : vector<8x128xf32>, vector<8x128xf32> -> vector<8x256xf32>
    %208 = arith.addf %0, %207 : vector<8x256xf32>
    %c0_59 = arith.constant 0 : index
    %c0_60 = arith.constant 0 : index
    %209 = vector.load %arg3[%c0_59, %c0_60] : memref<8x256xf32, #tpu.memory_space<vmem>>, vector<8x256xf32>
    tpu.vector_store %arg3[%c0_59, %c0_60], %208 {strides = array<i32>} : memref<8x256xf32, #tpu.memory_space<vmem>>, vector<8x256xf32>,
    return
  }
  func.func @transform_0(%arg0: i32) -> (i32, i32) {
    %c0_i32 = arith.constant 0 : i32
    %c0_i32_0 = arith.constant 0 : i32
    return %c0_i32, %arg0 : i32, i32
  }
  func.func @transform_1(%arg0: i32) -> (i32, i32) {
    %c0_i32 = arith.constant 0 : i32
    %c0_i32_0 = arith.constant 0 : i32
    %c0_i32_1 = arith.constant 0 : i32
    return %c0_i32, %c0_i32_0 : i32, i32
  }
  func.func @transform_2(%arg0: i32) -> (i32, i32) {
    %c0_i32 = arith.constant 0 : i32
    %c0_i32_0 = arith.constant 0 : i32
    return %c0_i32, %arg0 : i32, i32
  }
}

</mosaic_0001>

<bundles_post_ra>
// kernel: tpu_custom_call.1
= control target key start
LH: loop header
LB: loop body
LE: loop exit
PB: predicated region body
PF: predicated region fallthrough
CT: control target
= control target key end

     0   :  { %7 = vsyncpa [#allocation3], 0  ;;  %s3065_s0 = inlined_call_operand.hbm [shape: f32[8,256], index: 0, kind: input, shape index: {}]   ;;  %s3066_s1 = inlined_call_operand.hbm [shape: f32[16,102], index: 1, kind: input, shape index: {}]   ;;  %s3067_s2 = inlined_call_operand.hbm [shape: f32[8,256], index: 2, kind: output, shape index: {}]  }
   0x1   :  { %8 = vsyncpa [#allocation6], 0 }
   0x2   :  { %9 = vsyncpa [#allocation4], 0  ;;  %s2540_s9 = smov [#allocation2]   ;;  %s2541_s11 = smov [#allocation5]  }
   0x3   :  { %s16_s10 = sshll.u32 %s2540_s9, 4  ;;  %s25_s12 = sshll.u32 %s2541_s11, 4  ;;  %s17_s10 = int_to_ptr.vmem [resolvable:$true] %s16_s10  ;;  %s2571_s12 = int_to_ptr.vmem [resolvable:$true] %s25_s12 }
   0x4   :  { %s2468_s15 = scalar_lea.hbm %s3065_s0, 256 }
   0x5   :  { %p2469_p0 = scmp.ne.s32.totalorder %s3065_s0, %s2468_s15  ;;  %p2472_p1 = scmp.lt.u32.totalorder %s2468_s15, %s3065_s0 }
   0x7   :  { %p2474_p2 = pnand %p2472_p1, %p2469_p0 }
   0x9   :  { %2477 = shalt.err (!%p2474_p2)
}
   0xa   :  { %s2478_s20 = scalar_lea.vmem %s17_s10, 256  ;;  %p2483_p4 = scmp.lt.s32.totalorder %s17_s10, %s17_s10 }
   0xb   :  { %p2479_p3 = scmp.ne.s32.totalorder %s17_s10, %s2478_s20  ;;  %p2484_p5 = scmp.lt.s32.totalorder %s2478_s20, %s2478_s20 }
   0xd   :  { %p2485_p6 = por %p2484_p5, %p2483_p4 }
   0xf   :  { %p2486_p7 = pnand %p2485_p6, %p2479_p3 }
  0x11   :  { %2489 = shalt.err (!%p2486_p7)
}
  0x12   :  { %19 = dma.hbm_to_vmem [thread:$0]  %s3065_s0, 256, %s17_s10, [#allocation3]  }
  0x13   :  { %s2490_s25 = scalar_lea.hbm %s3066_s1, 256 }
  0x14   :  { %p2491_p8 = scmp.ne.s32.totalorder %s3066_s1, %s2490_s25  ;;  %p2494_p9 = scmp.lt.u32.totalorder %s2490_s25, %s3066_s1 }
  0x16   :  { %p2496_p10 = pnand %p2494_p9, %p2491_p8 }
  0x18   :  { %2499 = shalt.err (!%p2496_p10)
}
  0x19   :  { %s2500_s30 = scalar_lea.vmem %s2571_s12, 256  ;;  %p2505_p12 = scmp.lt.s32.totalorder %s2571_s12, %s2571_s12 }
  0x1a   :  { %p2501_p11 = scmp.ne.s32.totalorder %s2571_s12, %s2500_s30  ;;  %p2506_p13 = scmp.lt.s32.totalorder %s2500_s30, %s2500_s30 }
  0x1c   :  { %p2507_p0 = por %p2506_p13, %p2505_p12 }
  0x1e   :  { %p2508_p1 = pnand %p2507_p0, %p2501_p11 }
  0x20   :  { %2511 = shalt.err (!%p2508_p1)
}
  0x21   :  { %s2542_s0 = smov 128   ;;  %s2543_s3 = smov 8  }
  0x22   :  { %31 = dma.hbm_to_vmem [thread:$0]  %s3066_s1, 256, %s2571_s12, [#allocation6], %s2542_s0, %s2542_s0, %s2543_s3  }
  0x23   :  { %2534 = dma.done.wait [#allocation3], 256  }
  0x24   :  { %2535 = vsyncadd [#allocation3], 4294967040 }
  0x25   :  { %2536 = dma.done.wait [#allocation6], 256  }
  0x26   :  { %2537 = vsyncadd [#allocation6], 4294967040  ;;  %v2602_v0 = vld [vmem:[#allocation5] sm:$0xff]  ;;  %v2604_v1 = vld [vmem:[#allocation2] sm:$0xff]  ;;  %s2544_s6 = smov 104   ;;  %s2545_s7 = smov 1   ;;  %v42_v5 = vlaneseq }
  0x27   :  { %793 = vrot.lane.b32.xlu1 %v2602_v0, %s2544_s6  ;;  %73 = vrot.lane.b32.xlu0 %v2604_v1, %s2545_s7  ;;  %v2609_v2 = vld [vmem:[#allocation5 + $0x8] sm:$0xff]  ;;  %v39_v3 = vld [vmem:[#allocation2 + $0x8] sm:$0xff]  ;;  %v2546_v4 = vmov 0.0   ;;  %s2547_s1 = smov 127   ;;  %vm99_vm0 = vcmask 195584   ;;  %v112_v12 = vand.u32 4294901760, %v2604_v1 }
  0x28   :  { %176 = vmatprep.mubr.f32.mxu0 %v2546_v4  ;;  %871 = vmatprep.mubr.f32.mxu1 %v2546_v4  ;;  %v2618_v6 = vand.u32 127, %v42_v5  ;;  %v101_v7 = vsel %vm99_vm0, %v2602_v0, 0  ;;  %v104_v9 = vsel %vm99_vm0, %v2609_v2, 0  ;;  %v110_v11 = vand.u32 4294901760, %v39_v3  ;;  %s2552_s8 = smov 80   ;;  %s2555_s9 = smov [#allocation7]  }
  0x29   :  { %v2625_v10 = vand.u32 4294901760, %v101_v7  ;;  %v2628_v13 = vand.u32 4294901760, %v104_v9  ;;  %v2633_v18 = vsub.f32 %v2604_v1, %v112_v12  ;;  %vm1549_vm6 = vcmask 392192   ;;  %s2217_s10 = sshll.u32 %s2555_s9, 4  ;;  %s2218_s10 = int_to_ptr.vmem [resolvable:$true] %s2217_s10 }
  0x2a   :  { %v44_v8 = vadd.s32 128, %v2618_v6  ;;  %v2630_v17 = vsub.f32 %v39_v3, %v110_v11  ;;  %vm77_vm1 = vcmp.lt.s32.totalorder %v2618_v6, 1  ;;  %vm69_vm2 = vcmp.ge.s32.totalorder %v2618_v6, 1  ;;  %s2512_s11 = scalar_lea.vmem %s2218_s10, 256  ;;  %p2517_p3 = scmp.lt.s32.totalorder %s2218_s10, %s2218_s10 }
  0x2b   :  { %795 = vrot.lane.b32.xlu1 %v2609_v2, %s2544_s6  ;;  %75 = vrot.lane.b32.xlu0 %v39_v3, %s2545_s7  ;;  %v2636_v19 = vsub.f32 %v101_v7, %v2625_v10  ;;  %v2648_v23 = vsub.f32 %v104_v9, %v2628_v13  ;;  %v219_v29 = vand.u32 4294901760, %v2633_v18  ;;  %vm71_vm4 = vcmp.lt.s32.totalorder %v2618_v6, 127  ;;  %p2513_p2 = scmp.ne.s32.totalorder %s2218_s10, %s2512_s11  ;;  %p2518_p4 = scmp.lt.s32.totalorder %s2512_s11, %s2512_s11 }
  0x2c   :  { %v56_v14 = vand.u32 127, %v44_v8  ;;  %v213_v28 = vand.u32 4294901760, %v2630_v17 }
  0x2d   :  { %v179_v27 = vand.u32 4294901760, %v2636_v19  ;;  %v190_v40 = vand.u32 4294901760, %v2648_v23  ;;  %v220_v46 = vsub.f32 %v2633_v18, %v219_v29  ;;  %p2519_p5 = por %p2518_p4, %p2517_p3 }
  0x2e   :  { %vm2643_vm3 = vcmp.ge.s32.totalorder %v56_v14, 1  ;;  %vm2669_vm5 = vcmp.lt.s32.totalorder %v56_v14, 127  ;;  %v214_v45 = vsub.f32 %v2630_v17, %v213_v28 }
  0x2f   :  { %88 = vrot.lane.b32.xlu1 %v39_v3, %s2547_s1  ;;  %86 = vrot.lane.b32.xlu0 %v2604_v1, %s2547_s1  ;;  %v180_v44 = vsub.f32 %v2636_v19, %v179_v27  ;;  %v221_v61 = vand.u32 4294901760, %v220_v46  ;;  %v191_v62 = vsub.f32 %v2648_v23, %v190_v40  ;;  %p2520_p6 = pnand %p2519_p5, %p2513_p2 }
  0x30   :  { %v215_v5 = vand.u32 4294901760, %v214_v45  ;;  %v2548_v45 = vmov 98  }
  0x31   :  { %v181_v1 = vand.u32 4294901760, %v180_v44  ;;  %2417 = vset.pattern.permute.xlu0 %v2548_v45  ;;  %2418 = vset.pattern.permute.xlu1 %v2548_v45 }
  0x99   :  { %v794_v15 = vpop.permute.xlu1 %793  ;;  %v74_v16 = vpop.permute.xlu0 %73 }
  0x9a   :  { %v797_v20 = vsel %vm99_vm0, %v794_v15, 0 }
  0x9b   :  { %v2639_v21 = vand.u32 4294901760, %v797_v20 }
  0x9d   :  { %v2651_v24 = vsub.f32 %v797_v20, %v2639_v21  ;;  %v796_v25 = vpop.permute.xlu1 %795  ;;  %v76_v26 = vpop.permute.xlu0 %75 }
  0x9e   :  { %v799_v30 = vsel %vm99_vm0, %v796_v25, 0  ;;  %v78_v31 = vsel %vm77_vm1, %v74_v16, %v76_v26  ;;  %v79_v32 = vsel %vm77_vm1, %v76_v26, %v74_v16  ;;  %v192_v26 = vand.u32 4294901760, %v191_v62 }
  0x9f   :  { %v874_v33 = vand.u32 4294901760, %v2651_v24  ;;  %v2663_v34 = vand.u32 4294901760, %v799_v30  ;;  %v84_v35 = vsel %vm69_vm2, %v79_v32, 0.0  ;;  %v85_v36 = vsel %vm2643_vm3, %v78_v31, 0.0 }
  0xa0   :  { %v106_v37 = vand.u32 4294901760, %v85_v36  ;;  %v108_v38 = vand.u32 4294901760, %v84_v35 }
  0xa1   :  { %v2675_v41 = vsub.f32 %v799_v30, %v2663_v34  ;;  %v89_v42 = vpop.permute.xlu1 %88  ;;  %v87_v43 = vpop.permute.xlu0 %86  ;;  %v875_v54 = vsub.f32 %v2651_v24, %v874_v33 }
  0xa2   :  { %v2686_v47 = vpack.c.bf16 %v110_v11, %v106_v37  ;;  %v2688_v48 = vpack.c.bf16 %v112_v12, %v108_v38  ;;  %v2690_v49 = vsub.f32 %v85_v36, %v106_v37  ;;  %v2692_v50 = vsub.f32 %v84_v35, %v108_v38 }
  0xa3   :  { %v885_v51 = vand.u32 4294901760, %v2675_v41  ;;  %v91_v52 = vsel %vm71_vm4, %v87_v43, %v89_v42  ;;  %v92_v53 = vsel %vm71_vm4, %v89_v42, %v87_v43  ;;  %v876_v11 = vand.u32 4294901760, %v875_v54 }
  0xa4   :  { %v201_v55 = vand.u32 4294901760, %v2690_v49  ;;  %v207_v56 = vand.u32 4294901760, %v2692_v50  ;;  %v97_v57 = vsel %vm71_vm4, %v91_v52, 0.0  ;;  %v98_v58 = vsel %vm2669_vm5, %v92_v53, 0.0  ;;  %2232 = vmatprep.subr.bf16.mxu0 %v2686_v47  ;;  %2256 = vmatprep.subr.bf16.mxu1 %v2686_v47 }
  0xa5   :  { %v2710_v59 = vand.u32 4294901760, %v98_v58  ;;  %v2712_v60 = vand.u32 4294901760, %v97_v57  ;;  %2234 = vmatpush1.bf16.msra.mxu0 %v2688_v48  ;;  %2258 = vmatpush1.bf16.msra.mxu1 %v2688_v48  ;;  %v886_v14 = vsub.f32 %v2675_v41, %v885_v51  ;;  %v2239_v37 = vpack.c.bf16 %v2630_v17, %v2690_v49 }
  0xa6   :  { %v208_v63 = vsub.f32 %v2692_v50, %v207_v56  ;;  %v202_v3 = vsub.f32 %v2690_v49, %v201_v55  ;;  %v2241_v38 = vpack.c.bf16 %v2633_v18, %v2692_v50  ;;  %v2247_v42 = vpack.c.bf16 %v213_v28, %v201_v55 }
  0xa7   :  { %v224_v7 = vsub.f32 %v98_v58, %v2710_v59  ;;  %v230_v8 = vsub.f32 %v97_v57, %v2712_v60  ;;  %115 = vmatprep.subr.mxu0 %v2710_v59  ;;  %810 = vmatprep.subr.mxu1 %v2710_v59  ;;  %v887_v32 = vand.u32 4294901760, %v886_v14  ;;  %v2249_v43 = vpack.c.bf16 %v219_v29, %v207_v56 }
  0xa8   :  { %v209_v9 = vand.u32 4294901760, %v208_v63  ;;  %v203_v12 = vand.u32 4294901760, %v202_v3 }
  0xa9   :  { %v2732_v15 = vand.u32 4294901760, %v230_v8  ;;  %117 = vmatpush1.msra.mxu0 %v2712_v60  ;;  %812 = vmatpush1.msra.mxu1 %v2712_v60  ;;  %v2736_v16 = vand.u32 4294901760, %v224_v7 }
  0xaa   :  { %182 = vmatmul.mubr.f32.vlgmr.msra.gmra.mrb[0].mxu0 %v181_v1  ;;  %877 = vmatmul.mubr.f32.vlgmr.msra.gmra.mrb[0].mxu1 %v876_v11  ;;  %v2235_v20 = vpack.c.bf16 %v215_v5, %v203_v12  ;;  %v2237_v25 = vpack.c.bf16 %v221_v61, %v209_v9 }
  0xab   :  { %187 = vmatprep.mubr.f32.mxu0 %v2546_v4  ;;  %882 = vmatprep.mubr.f32.mxu1 %v2546_v4  ;;  %v226_v30 = vsub.f32 %v224_v7, %v2736_v16  ;;  %v232_v31 = vsub.f32 %v230_v8, %v2732_v15 }
  0xac   :  { %2236 = vmatprep.subr.bf16.mxu0 %v2235_v20  ;;  %2260 = vmatprep.subr.bf16.mxu1 %v2235_v20 }
  0xad   :  { %2238 = vmatpush1.bf16.msra.mxu0 %v2237_v25  ;;  %2262 = vmatpush1.bf16.msra.mxu1 %v2237_v25  ;;  %v227_v35 = vand.u32 4294901760, %v226_v30  ;;  %v233_v36 = vand.u32 4294901760, %v232_v31 }
  0xae   :  { %193 = vmatmul.mubr.f32.gmra.mrb[2].mxu0 %v192_v26  ;;  %888 = vmatmul.mubr.f32.gmra.mrb[2].mxu1 %v887_v32 }
  0xaf   :  { %228 = vmatprep.subr.mxu0 %v227_v35  ;;  %923 = vmatprep.subr.mxu1 %v227_v35 }
  0xb0   :  { %293 = vmatprep.mubr.f32.mxu0 %v2546_v4  ;;  %988 = vmatprep.mubr.f32.mxu1 %v2546_v4 }
  0xb1   :  { %234 = vmatpush1.msra.mxu0 %v233_v36  ;;  %929 = vmatpush1.msra.mxu1 %v233_v36 }
  0xb2   :  { %295 = vmatmul.mubr.f32.vlgmr.msra.gmra.mrb[0].mxu0 %v2625_v10  ;;  %2240 = vmatprep.subr.bf16.mxu0 %v2239_v37 }
  0xb3   :  { %990 = vmatmul.mubr.f32.vlgmr.msra.gmra.mrb[0].mxu1 %v2639_v21  ;;  %2264 = vmatprep.subr.bf16.mxu1 %v2239_v37 }
  0xb4   :  { %2242 = vmatpush1.bf16.msra.mxu0 %v2241_v38  ;;  %2266 = vmatpush1.bf16.msra.mxu1 %v2241_v38 }
  0xb5   :  { %322 = vmatprep.subr.mxu0 %v224_v7  ;;  %1017 = vmatprep.subr.mxu1 %v224_v7 }
  0xb6   :  { %300 = vmatprep.mubr.f32.mxu0 %v2546_v4  ;;  %995 = vmatprep.mubr.f32.mxu1 %v2546_v4 }
  0xb7   :  { %302 = vmatmul.mubr.f32.gmra.mrb[2].mxu0 %v2628_v13  ;;  %997 = vmatmul.mubr.f32.gmra.mrb[2].mxu1 %v2663_v34 }
  0xb8   :  { %325 = vmatpush1.msra.mxu0 %v230_v8  ;;  %1020 = vmatpush1.msra.mxu1 %v230_v8 }
  0xb9   :  { %2244 = vmatprep.subr.bf16.mxu0 %v2686_v47  ;;  %2268 = vmatprep.subr.bf16.mxu1 %v2686_v47 }
  0xba   :  { %384 = vmatprep.mubr.f32.mxu0 %v2546_v4  ;;  %1079 = vmatprep.mubr.f32.mxu1 %v2546_v4 }
  0xbb   :  { %387 = vmatmul.mubr.f32.vlgmr.msra.gmra.mrb[0].mxu0 %v2636_v19  ;;  %1082 = vmatmul.mubr.f32.vlgmr.msra.gmra.mrb[0].mxu1 %v2651_v24 }
  0xbc   :  { %2246 = vmatpush1.bf16.msra.mxu0 %v2688_v48  ;;  %2270 = vmatpush1.bf16.msra.mxu1 %v2688_v48 }
  0xbd   :  { %410 = vmatprep.subr.mxu0 %v2710_v59  ;;  %1105 = vmatprep.subr.mxu1 %v2710_v59 }
  0xbe   :  { %392 = vmatprep.mubr.f32.mxu0 %v2546_v4  ;;  %1087 = vmatprep.mubr.f32.mxu1 %v2546_v4 }
  0xbf   :  { %395 = vmatmul.mubr.f32.gmra.mrb[2].mxu0 %v2648_v23  ;;  %1090 = vmatmul.mubr.f32.gmra.mrb[2].mxu1 %v2675_v41 }
  0xc0   :  { %412 = vmatpush1.msra.mxu0 %v2712_v60  ;;  %1107 = vmatpush1.msra.mxu1 %v2712_v60 }
  0xc1   :  { %2248 = vmatprep.subr.bf16.mxu0 %v2247_v42  ;;  %2272 = vmatprep.subr.bf16.mxu1 %v2247_v42 }
  0xc2   :  { %471 = vmatprep.mubr.f32.mxu0 %v2546_v4  ;;  %1166 = vmatprep.mubr.f32.mxu1 %v2546_v4 }
  0xc3   :  { %475 = vmatmul.mubr.f32.vlgmr.msra.gmra.mrb[0].mxu0 %v179_v27  ;;  %1170 = vmatmul.mubr.f32.vlgmr.msra.gmra.mrb[0].mxu1 %v874_v33 }
  0xc4   :  { %2250 = vmatpush1.bf16.msra.mxu0 %v2249_v43  ;;  %2274 = vmatpush1.bf16.msra.mxu1 %v2249_v43 }
  0xc5   :  { %509 = vmatprep.subr.mxu0 %v2736_v16  ;;  %1204 = vmatprep.subr.mxu1 %v2736_v16 }
  0xc6   :  { %480 = vmatprep.mubr.f32.mxu0 %v2546_v4  ;;  %1175 = vmatprep.mubr.f32.mxu1 %v2546_v4 }
  0xc7   :  { %484 = vmatmul.mubr.f32.gmra.mrb[2].mxu0 %v190_v40  ;;  %1179 = vmatmul.mubr.f32.gmra.mrb[2].mxu1 %v885_v51 }
  0xc8   :  { %513 = vmatpush1.msra.mxu0 %v2732_v15  ;;  %1208 = vmatpush1.msra.mxu1 %v2732_v15 }
  0xc9   :  { %2252 = vmatprep.subr.bf16.mxu0 %v2686_v47  ;;  %2276 = vmatprep.subr.bf16.mxu1 %v2686_v47 }
  0xca   :  { %572 = vmatprep.mubr.f32.mxu0 %v2546_v4  ;;  %1267 = vmatprep.mubr.f32.mxu1 %v2546_v4 }
  0xcb   :  { %574 = vmatmul.mubr.f32.vlgmr.msra.gmra.mrb[0].mxu0 %v2625_v10  ;;  %1269 = vmatmul.mubr.f32.vlgmr.msra.gmra.mrb[0].mxu1 %v2639_v21 }
  0xcc   :  { %2254 = vmatpush1.bf16.msra.mxu0 %v2688_v48  ;;  %2278 = vmatpush1.bf16.msra.mxu1 %v2688_v48 }
  0xcd   :  { %596 = vmatprep.subr.mxu0 %v2710_v59  ;;  %1291 = vmatprep.subr.mxu1 %v2710_v59 }
  0xce   :  { %579 = vmatprep.mubr.f32.mxu0 %v2546_v4  ;;  %1274 = vmatprep.mubr.f32.mxu1 %v2546_v4 }
  0xcf   :  { %581 = vmatmul.mubr.f32.gmra.mrb[2].mxu0 %v2628_v13  ;;  %1276 = vmatmul.mubr.f32.gmra.mrb[2].mxu1 %v2663_v34 }
  0xd0   :  { %598 = vmatpush1.msra.mxu0 %v2712_v60  ;;  %1293 = vmatpush1.msra.mxu1 %v2712_v60 }
  0xd1   :  { %657 = vmatprep.mubr.f32.mxu0 %v2546_v4  ;;  %1352 = vmatprep.mubr.f32.mxu1 %v2546_v4 }
  0xd3   :  { %659 = vmatmul.mubr.f32.vlgmr.msra.gmra.mrb[0].mxu0 %v2625_v10  ;;  %1354 = vmatmul.mubr.f32.vlgmr.msra.gmra.mrb[0].mxu1 %v2639_v21 }
  0xd4   :  { %664 = vmatprep.mubr.f32.mxu0 %v2546_v4  ;;  %1359 = vmatprep.mubr.f32.mxu1 %v2546_v4 }
  0xd7   :  { %666 = vmatmul.mubr.f32.gmra.mrb[2].mxu0 %v2628_v13  ;;  %1361 = vmatmul.mubr.f32.gmra.mrb[2].mxu1 %v2663_v34 }
  0xd8   :  { %1628 = vmatprep.mubr.f32.mxu1 %v2546_v4  ;;  %1945 = vmatprep.mubr.f32.mxu0 %v2546_v4 }
 0x1a6   :  { %v2820_v17 = vpop.f32.mrb[0].mxu0  ;;  %v2822_v18 = vpop.f32.mrb[0].mxu1 }
 0x1a7   :  { %1367 = vadd.xlane.f32.xlu0 %v2822_v18  ;;  %v2825_v10 = vpop.f32.mrb[1].mxu0  ;;  %v2827_v19 = vpop.f32.mrb[1].mxu1  ;;  %v1373_v21 = vmul.f32 %v2822_v18, %v2822_v18  ;;  %v679_v34 = vmul.f32 %v2820_v17, %v2820_v17 }
 0x1a8   :  { %v1433_v28 = vmul.f32 %v2827_v19, %v2827_v19  ;;  %v739_v40 = vmul.f32 %v2825_v10, %v2825_v10 }
 0x1a9   :  { %1375 = vadd.xlane.f32.xlu1 %v1373_v21 }
 0x1aa   :  { %v2831_v13 = vpop.f32.mrb[2].mxu0  ;;  %v2833_v23 = vpop.f32.mrb[2].mxu1 }
 0x1ab   :  { %1427 = vadd.xlane.f32.xlu0 %v2827_v19  ;;  %v2836_v24 = vpop.f32.mrb[3].mxu0  ;;  %v2838_v27 = vpop.f32.mrb[3].mxu1  ;;  %v1374_v29 = vmul.f32 %v2833_v23, %v2833_v23  ;;  %v680_v41 = vmul.f32 %v2831_v13, %v2831_v13 }
 0x1ac   :  { %v1434_v33 = vmul.f32 %v2838_v27, %v2838_v27  ;;  %v740_v44 = vmul.f32 %v2836_v24, %v2836_v24 }
 0x1ad   :  { %1369 = vadd.xlane.f32.xlu1 %v2833_v23 }
 0x1af   :  { %1429 = vadd.xlane.f32.xlu0 %v2838_v27 }
 0x1b1   :  { %1435 = vadd.xlane.f32.xlu1 %v1433_v28 }
 0x1b3   :  { %1377 = vadd.xlane.f32.xlu0 %v1374_v29 }
 0x1b5   :  { %672 = vadd.xlane.f32.xlu1 %v2820_v17 }
 0x1b7   :  { %1437 = vadd.xlane.f32.xlu0 %v1434_v33 }
 0x1b9   :  { %733 = vadd.xlane.f32.xlu1 %v2825_v10 }
 0x1bb   :  { %674 = vadd.xlane.f32.xlu0 %v2831_v13 }
 0x1bd   :  { %681 = vadd.xlane.f32.xlu1 %v679_v34 }
 0x1bf   :  { %735 = vadd.xlane.f32.xlu0 %v2836_v24 }
 0x1c1   :  { %741 = vadd.xlane.f32.xlu1 %v739_v40 }
 0x1c3   :  { %683 = vadd.xlane.f32.xlu0 %v680_v41 }
 0x1c7   :  { %743 = vadd.xlane.f32.xlu0 %v740_v44 }
 0x234   :  { %v1368_v46 = vpop.xlane.xlu0 %1367 }
 0x235   :  { %v1371_v47 = vmul.f32 0.0078125, %v1368_v46 }
 0x236   :  { %v1376_v48 = vpop.xlane.xlu1 %1375 }
 0x237   :  { %v1381_v49 = vmul.f32 %v1371_v47, %v1371_v47  ;;  %v1379_v50 = vmul.f32 0.0078125, %v1376_v48 }
 0x238   :  { %v1428_v51 = vpop.xlane.xlu0 %1427 }
 0x239   :  { %v1383_v52 = vsub.f32 %v1379_v50, %v1381_v49  ;;  %v1431_v55 = vmul.f32 0.0078125, %v1428_v51 }
 0x23a   :  { %v1370_v53 = vpop.xlane.xlu1 %1369 }
 0x23b   :  { %v1385_v54 = vadd.f32 1e-05, %v1383_v52  ;;  %v1372_v57 = vmul.f32 0.0078125, %v1370_v53  ;;  %v1441_v59 = vmul.f32 %v1431_v55, %v1431_v55 }
 0x23c   :  { %v1430_v56 = vpop.xlane.xlu0 %1429 }
 0x23d   :  { %2429 = vrsqrt.f32 %v1385_v54  ;;  %v1382_v62 = vmul.f32 %v1372_v57, %v1372_v57  ;;  %v1432_v63 = vmul.f32 0.0078125, %v1430_v56 }
 0x23e   :  { %v1436_v58 = vpop.xlane.xlu1 %1435 }
 0x23f   :  { %v1439_v60 = vmul.f32 0.0078125, %v1436_v58  ;;  %v1442_v11 = vmul.f32 %v1432_v63, %v1432_v63 }
 0x240   :  { %v1378_v61 = vpop.xlane.xlu0 %1377 }
 0x241   :  { %v1443_v1 = vsub.f32 %v1439_v60, %v1441_v59  ;;  %v1380_v3 = vmul.f32 0.0078125, %v1378_v61 }
 0x242   :  { %v673_v5 = vpop.xlane.xlu1 %672 }
 0x243   :  { %v1445_v7 = vadd.f32 1e-05, %v1443_v1  ;;  %v1384_v8 = vsub.f32 %v1380_v3, %v1382_v62  ;;  %v677_v20 = vmul.f32 0.0078125, %v673_v5 }
 0x244   :  { %v1438_v9 = vpop.xlane.xlu0 %1437 }
 0x245   :  { %2431 = vrsqrt.f32 %v1445_v7  ;;  %v1386_v12 = vadd.f32 1e-05, %v1384_v8  ;;  %v1440_v14 = vmul.f32 0.0078125, %v1438_v9  ;;  %v687_v36 = vmul.f32 %v677_v20, %v677_v20 }
 0x246   :  { %v734_v15 = vpop.xlane.xlu1 %733 }
 0x247   :  { %v2430_v16 = vpop.eup %2429  ;;  %2433 = vrsqrt.f32 %v1386_v12  ;;  %v1444_v25 = vsub.f32 %v1440_v14, %v1442_v11  ;;  %v737_v37 = vmul.f32 0.0078125, %v734_v15 }
 0x248   :  { %v675_v26 = vpop.xlane.xlu0 %674  ;;  %v1389_v30 = vmul.f32 %v2430_v16, %v2602_v0 }
 0x249   :  { %v1446_v31 = vadd.f32 1e-05, %v1444_v25  ;;  %v678_v42 = vmul.f32 0.0078125, %v675_v26  ;;  %v747_v33 = vmul.f32 %v737_v37, %v737_v37 }
 0x24a   :  { %v682_v32 = vpop.xlane.xlu1 %681  ;;  %v1403_v35 = vmul.f32 %v1389_v30, %v1371_v47 }
 0x24b   :  { %2435 = vrsqrt.f32 %v1446_v31  ;;  %v685_v38 = vmul.f32 0.0078125, %v682_v32  ;;  %v688_v41 = vmul.f32 %v678_v42, %v678_v42 }
 0x24c   :  { %1407 = vrot.lane.b32.xlu1 %v1403_v35, %s2545_s7  ;;  %v736_v43 = vpop.xlane.xlu0 %735 }
 0x24d   :  { %v689_v21 = vsub.f32 %v685_v38, %v687_v36  ;;  %v738_v47 = vmul.f32 0.0078125, %v736_v43 }
 0x24e   :  { %v742_v28 = vpop.xlane.xlu1 %741 }
 0x24f   :  { %v2432_v29 = vpop.eup %2431  ;;  %v691_v34 = vadd.f32 1e-05, %v689_v21  ;;  %v745_v40 = vmul.f32 0.0078125, %v742_v28  ;;  %v748_v59 = vmul.f32 %v738_v47, %v738_v47  ;;  %v2551_v28 = vmov 97  }
 0x250   :  { %v684_v44 = vpop.xlane.xlu0 %683  ;;  %v1449_v45 = vmul.f32 %v2432_v29, %v2602_v0 }
 0x251   :  { %v2434_v46 = vpop.eup %2433  ;;  %2437 = vrsqrt.f32 %v691_v34  ;;  %v749_v48 = vsub.f32 %v745_v40, %v747_v33  ;;  %v686_v49 = vmul.f32 0.0078125, %v684_v44 }
 0x252   :  { %v1463_v50 = vmul.f32 %v1449_v45, %v1431_v55  ;;  %v1390_v51 = vmul.f32 %v2434_v46, %v2609_v2 }
 0x253   :  { %v751_v52 = vadd.f32 1e-05, %v749_v48  ;;  %v690_v53 = vsub.f32 %v686_v49, %v688_v41 }
 0x254   :  { %1467 = vrot.lane.b32.xlu1 %v1463_v50, %s2545_s7  ;;  %v744_v54 = vpop.xlane.xlu0 %743  ;;  %v1404_v56 = vmul.f32 %v1390_v51, %v1372_v57 }
 0x255   :  { %v2436_v58 = vpop.eup %2435  ;;  %2439 = vrsqrt.f32 %v751_v52  ;;  %v692_v60 = vadd.f32 1e-05, %v690_v53  ;;  %v746_v61 = vmul.f32 0.0078125, %v744_v54 }
 0x256   :  { %1409 = vrot.lane.b32.xlu0 %v1404_v56, %s2545_s7  ;;  %v1450_v62 = vmul.f32 %v2436_v58, %v2609_v2 }
 0x257   :  { %2441 = vrsqrt.f32 %v692_v60  ;;  %v750_v1 = vsub.f32 %v746_v61, %v748_v59 }
 0x258   :  { %v1464_v55 = vmul.f32 %v1450_v62, %v1432_v63 }
 0x259   :  { %v752_v3 = vadd.f32 1e-05, %v750_v1 }
 0x25a   :  { %1469 = vrot.lane.b32.xlu1 %v1464_v55, %s2545_s7 }
 0x25b   :  { %v2438_v5 = vpop.eup %2437  ;;  %2443 = vrsqrt.f32 %v752_v3 }
 0x25c   :  { %v695_v7 = vmul.f32 %v2438_v5, %v2602_v0 }
 0x25e   :  { %v709_v57 = vmul.f32 %v695_v7, %v677_v20  ;;  %v2549_v20 = vmov 99  }
 0x25f   :  { %v2440_v8 = vpop.eup %2439 }
 0x260   :  { %713 = vrot.lane.b32.xlu0 %v709_v57, %s2545_s7  ;;  %v755_v9 = vmul.f32 %v2440_v8, %v2602_v0 }
 0x261   :  { %v2442_v11 = vpop.eup %2441 }
 0x262   :  { %v769_v12 = vmul.f32 %v755_v9, %v737_v37  ;;  %v696_v14 = vmul.f32 %v2442_v11, %v2609_v2 }
 0x264   :  { %773 = vrot.lane.b32.xlu0 %v769_v12, %s2545_s7  ;;  %v710_v63 = vmul.f32 %v696_v14, %v678_v42  ;;  %v2550_v42 = vmov 96  }
 0x265   :  { %v2444_v15 = vpop.eup %2443 }
 0x266   :  { %715 = vrot.lane.b32.xlu1 %v710_v63, %s2545_s7  ;;  %v756_v16 = vmul.f32 %v2444_v15, %v2609_v2 }
 0x268   :  { %1393 = vperm.xlu0 %2417, %v1389_v30   ;;  %v770_v25 = vmul.f32 %v756_v16, %v738_v47 }
 0x26a   :  { %775 = vrot.lane.b32.xlu1 %v770_v25, %s2545_s7 }
 0x26c   :  { %1458 = vperm.xlu0 %2417, %v1450_v62  }
 0x26e   :  { %1398 = vperm.xlu1 %2418, %v1390_v51  }
 0x270   :  { %2420 = vset.pattern.permute.xlu0 %v2549_v20 }
 0x272   :  { %1453 = vperm.xlu1 %2418, %v1449_v45  }
 0x276   :  { %2419 = vset.pattern.permute.xlu1 %v2549_v20 }
 0x2be   :  { %v1408_v26 = vpop.permute.xlu1 %1407 }
 0x2bf   :  { %v1413_v31 = vsub.f32 %v2602_v0, %v1408_v26 }
 0x2c1   :  { %1417 = vperm.xlu1 %2419, %v1413_v31  }
 0x2c6   :  { %v1468_v32 = vpop.permute.xlu1 %1467 }
 0x2c7   :  { %v1473_v35 = vsub.f32 %v2602_v0, %v1468_v32 }
 0x2c8   :  { %v1410_v36 = vpop.permute.xlu0 %1409 }
 0x2c9   :  { %v1414_v37 = vsub.f32 %v2609_v2, %v1410_v36  ;;  %1477 = vperm.xlu1 %2419, %v1473_v35  }
 0x2cb   :  { %1422 = vperm.xlu0 %2420, %v1414_v37  }
 0x2cc   :  { %v1470_v30 = vpop.permute.xlu1 %1469 }
 0x2cd   :  { %v1474_v38 = vsub.f32 %v2609_v2, %v1470_v30 }
 0x2cf   :  { %1482 = vperm.xlu1 %2419, %v1474_v38   ;;  %2421 = vset.pattern.permute.xlu0 %v2550_v42 }
 0x2d0   :  { %699 = vperm.xlu0 %2421, %v695_v7  }
 0x2d2   :  { %v714_v43 = vpop.permute.xlu0 %713 }
 0x2d3   :  { %2422 = vset.pattern.permute.xlu1 %v2550_v42  ;;  %v719_v33 = vsub.f32 %v2602_v0, %v714_v43 }
 0x2d4   :  { %704 = vperm.xlu1 %2422, %v696_v14   ;;  %764 = vperm.xlu0 %2421, %v756_v16  }
 0x2d6   :  { %v774_v34 = vpop.permute.xlu0 %773 }
 0x2d7   :  { %v779_v40 = vsub.f32 %v2602_v0, %v774_v34 }
 0x2d8   :  { %v716_v21 = vpop.permute.xlu1 %715  ;;  %759 = vperm.xlu1 %2422, %v755_v9   ;;  %2424 = vset.pattern.permute.xlu0 %v2551_v28 }
 0x2d9   :  { %v720_v29 = vsub.f32 %v2609_v2, %v716_v21 }
 0x2db   :  { %728 = vperm.xlu0 %2424, %v720_v29  }
 0x2dc   :  { %2423 = vset.pattern.permute.xlu1 %v2551_v28  ;;  %v776_v41 = vpop.permute.xlu1 %775 }
 0x2dd   :  { %723 = vperm.xlu1 %2423, %v719_v33   ;;  %v780_v44 = vsub.f32 %v2609_v2, %v776_v41 }
 0x2e1   :  { %783 = vperm.xlu1 %2423, %v779_v40  }
 0x2e5   :  { %788 = vperm.xlu1 %2423, %v780_v44  }
 0x2e7   :  { %v1394_v46 = vpop.permute.xlu0 %1393 }
 0x2e8   :  { %v1401_v48 = vmul.f32 %v1394_v46, %v2822_v18 }
 0x2eb   :  { %v1459_v52 = vpop.permute.xlu0 %1458 }
 0x2ec   :  { %v1462_v61 = vmul.f32 %v1459_v52, %v2838_v27 }
 0x2ed   :  { %v1399_v45 = vpop.permute.xlu1 %1398 }
 0x2ee   :  { %v1402_v56 = vmul.f32 %v1399_v45, %v2833_v23 }
 0x2f1   :  { %v1454_v47 = vpop.permute.xlu1 %1453 }
 0x2f2   :  { %v1461_v53 = vmul.f32 %v1454_v47, %v2827_v19 }
 0x340   :  { %v1418_v49 = vpop.permute.xlu1 %1417 }
 0x341   :  { %v1425_v50 = vadd.f32 %v1418_v49, %v1401_v48 }
 0x343   :  { %v2227_v51 = vmul.f32 -1.442695, %v1425_v50 }
 0x345   :  { %2445 = vpow2.f32 %v2227_v51 }
 0x348   :  { %v1478_v54 = vpop.permute.xlu1 %1477 }
 0x349   :  { %v1485_v58 = vadd.f32 %v1478_v54, %v1461_v53 }
 0x34a   :  { %v1423_v59 = vpop.permute.xlu0 %1422 }
 0x34b   :  { %v2228_v60 = vmul.f32 -1.442695, %v1485_v58  ;;  %v1426_v2 = vadd.f32 %v1423_v59, %v1402_v56 }
 0x34d   :  { %2447 = vpow2.f32 %v2228_v60  ;;  %v2229_v62 = vmul.f32 -1.442695, %v1426_v2 }
 0x34e   :  { %v1483_v1 = vpop.permute.xlu1 %1482 }
 0x34f   :  { %v2446_v18 = vpop.eup %2445  ;;  %2449 = vpow2.f32 %v2229_v62  ;;  %v1486_v55 = vadd.f32 %v1483_v1, %v1462_v61  ;;  %v700_v8 = vpop.permute.xlu0 %699 }
 0x350   :  { %v1499_v3 = vadd.f32 1.0, %v2446_v18  ;;  %v707_v27 = vmul.f32 %v700_v8, %v2820_v17 }
 0x351   :  { %v2230_v5 = vmul.f32 -1.442695, %v1486_v55 }
 0x353   :  { %2451 = vpow2.f32 %v2230_v5  ;;  %v705_v7 = vpop.permute.xlu1 %704  ;;  %v765_v25 = vpop.permute.xlu0 %764 }
 0x354   :  { %2453 = vrcp.f32 %v1499_v3  ;;  %v708_v36 = vmul.f32 %v705_v7, %v2831_v13  ;;  %v768_v28 = vmul.f32 %v765_v25, %v2836_v24 }
 0x357   :  { %v2448_v19 = vpop.eup %2447  ;;  %v760_v57 = vpop.permute.xlu1 %759 }
 0x358   :  { %v1500_v23 = vadd.f32 1.0, %v2448_v19  ;;  %v767_v31 = vmul.f32 %v760_v57, %v2825_v10 }
 0x359   :  { %v2450_v9 = vpop.eup %2449 }
 0x35a   :  { %2455 = vrcp.f32 %v1500_v23  ;;  %v1501_v11 = vadd.f32 1.0, %v2450_v9  ;;  %v729_v35 = vpop.permute.xlu0 %728 }
 0x35b   :  { %v732_v38 = vadd.f32 %v729_v35, %v708_v36 }
 0x35c   :  { %2457 = vrcp.f32 %v1501_v11  ;;  %v724_v12 = vpop.permute.xlu1 %723 }
 0x35d   :  { %v2452_v14 = vpop.eup %2451  ;;  %v731_v63 = vadd.f32 %v724_v12, %v707_v27 }
 0x35e   :  { %v2454_v15 = vpop.eup %2453  ;;  %v1502_v16 = vadd.f32 1.0, %v2452_v14 }
 0x35f   :  { %v1511_v20 = vmul.f32 %v2454_v15, %v731_v63 }
 0x360   :  { %2459 = vrcp.f32 %v1502_v16  ;;  %v784_v26 = vpop.permute.xlu1 %783 }
 0x361   :  { %1515 = vrot.lane.b32.xlu0 %v1511_v20, %s2545_s7  ;;  %v1562_v32 = vand.u32 4294901760, %v1511_v20  ;;  %v791_v37 = vadd.f32 %v784_v26, %v767_v31 }
 0x363   :  { %v2892_v30 = vsub.f32 %v1511_v20, %v1562_v32 }
 0x364   :  { %v2456_v17 = vpop.eup %2455  ;;  %v789_v21 = vpop.permute.xlu1 %788 }
 0x365   :  { %v1512_v42 = vmul.f32 %v2456_v17, %v791_v37  ;;  %1531 = vrot.lane.b32.xlu0 %v1511_v20, %s2547_s1  ;;  %v1672_v33 = vand.u32 4294901760, %v2892_v30  ;;  %v792_v34 = vadd.f32 %v789_v21, %v768_v28 }
 0x366   :  { %v2458_v43 = vpop.eup %2457 }
 0x367   :  { %v1513_v29 = vmul.f32 %v2458_v43, %v732_v38  ;;  %v1560_v10 = vand.u32 4294901760, %v1512_v42  ;;  %v1673_v24 = vsub.f32 %v2892_v30, %v1672_v33 }
 0x369   :  { %1519 = vrot.lane.b32.xlu0 %v1512_v42, %s2545_s7  ;;  %1517 = vrot.lane.b32.xlu1 %v1513_v29, %s2545_s7  ;;  %v2899_v13 = vsub.f32 %v1512_v42, %v1560_v10  ;;  %v1566_v40 = vand.u32 4294901760, %v1513_v29  ;;  %v1674_v54 = vand.u32 4294901760, %v1673_v24 }
 0x36a   :  { %v2460_v41 = vpop.eup %2459 }
 0x36b   :  { %v1514_v44 = vmul.f32 %v2460_v41, %v792_v34  ;;  %v2901_v45 = vpack.c.bf16 %v1566_v40, %v1562_v32  ;;  %v2903_v46 = vsub.f32 %v1513_v29, %v1566_v40  ;;  %v1666_v48 = vand.u32 4294901760, %v2899_v13 }
 0x36d   :  { %1535 = vrot.lane.b32.xlu0 %v1512_v42, %s2547_s1  ;;  %1521 = vrot.lane.b32.xlu1 %v1514_v44, %s2545_s7  ;;  %v1564_v47 = vand.u32 4294901760, %v1514_v44  ;;  %v1684_v49 = vand.u32 4294901760, %v2903_v46  ;;  %v2309_v50 = vpack.c.bf16 %v2903_v46, %v2892_v30  ;;  %v1667_v58 = vsub.f32 %v2899_v13, %v1666_v48 }
 0x36f   :  { %v2912_v51 = vpack.c.bf16 %v1564_v47, %v1560_v10  ;;  %v2914_v52 = vsub.f32 %v1514_v44, %v1564_v47  ;;  %v1685_v53 = vsub.f32 %v2903_v46, %v1684_v49  ;;  %v2917_v56 = vpack.c.bf16 %v1684_v49, %v1672_v33 }
 0x370   :  { %v1668_v18 = vand.u32 4294901760, %v1667_v58 }
 0x371   :  { %1533 = vrot.lane.b32.xlu1 %v1513_v29, %s2547_s1  ;;  %1547 = vrot.lane.b32.xlu0 %v2602_v0, %s2552_s8  ;;  %v1678_v59 = vand.u32 4294901760, %v2914_v52  ;;  %v1686_v60 = vand.u32 4294901760, %v1685_v53  ;;  %v2307_v2 = vpack.c.bf16 %v2914_v52, %v2899_v13 }
 0x373   :  { %v1679_v61 = vsub.f32 %v2914_v52, %v1678_v59  ;;  %v2926_v62 = vpack.c.bf16 %v1678_v59, %v1666_v48  ;;  %v2928_v1 = vpack.c.bf16 %v1686_v60, %v1674_v54 }
 0x375   :  { %1537 = vrot.lane.b32.xlu1 %v1514_v44, %s2547_s1  ;;  %v1680_v55 = vand.u32 4294901760, %v1679_v61 }
 0x377   :  { %v2931_v3 = vpack.c.bf16 %v1680_v55, %v1668_v18 }
 0x3d3   :  { %v1516_v0 = vpop.permute.xlu0 %1515 }
 0x3d7   :  { %v1532_v5 = vpop.permute.xlu0 %1531 }
 0x3db   :  { %v1518_v7 = vpop.permute.xlu1 %1517  ;;  %v1520_v19 = vpop.permute.xlu0 %1519 }
 0x3dc   :  { %v1523_v57 = vsel %vm77_vm1, %v1516_v0, %v1520_v19  ;;  %v1525_v23 = vsel %vm77_vm1, %v1520_v19, %v1516_v0 }
 0x3dd   :  { %v1527_v8 = vsel %vm69_vm2, %v1525_v23, 0.0  ;;  %v1528_v9 = vsel %vm2643_vm3, %v1523_v57, 0.0 }
 0x3de   :  { %v1552_v11 = vand.u32 4294901760, %v1528_v9  ;;  %v1554_v27 = vand.u32 4294901760, %v1527_v8 }
 0x3df   :  { %v1522_v12 = vpop.permute.xlu1 %1521  ;;  %v1536_v14 = vpop.permute.xlu0 %1535 }
 0x3e0   :  { %v2941_v63 = vsub.f32 %v1528_v9, %v1552_v11  ;;  %v1524_v15 = vsel %vm77_vm1, %v1518_v7, %v1522_v12  ;;  %v1526_v16 = vsel %vm77_vm1, %v1522_v12, %v1518_v7  ;;  %v1539_v26 = vsel %vm71_vm4, %v1532_v5, %v1536_v14 }
 0x3e1   :  { %v1529_v25 = vsel %vm69_vm2, %v1526_v16, 0.0  ;;  %v1530_v20 = vsel %vm2643_vm3, %v1524_v15, 0.0  ;;  %v1541_v31 = vsel %vm71_vm4, %v1536_v14, %v1532_v5  ;;  %v2955_v36 = vsub.f32 %v1527_v8, %v1554_v27 }
 0x3e2   :  { %v1556_v32 = vand.u32 4294901760, %v1530_v20  ;;  %v1558_v35 = vand.u32 4294901760, %v1529_v25  ;;  %v1544_v37 = vsel %vm2669_vm5, %v1541_v31, 0.0  ;;  %v1543_v21 = vsel %vm71_vm4, %v1539_v26, 0.0 }
 0x3e3   :  { %v1534_v17 = vpop.permute.xlu1 %1533  ;;  %v1548_v38 = vpop.permute.xlu0 %1547  ;;  %v1642_v28 = vand.u32 4294901760, %v2941_v63  ;;  %v1568_v29 = vand.u32 4294901760, %v1544_v37  ;;  %v1648_v41 = vand.u32 4294901760, %v2955_v36  ;;  %v1570_v24 = vand.u32 4294901760, %v1543_v21 }
 0x3e4   :  { %v2959_v42 = vpack.c.bf16 %v1558_v35, %v1554_v27  ;;  %v2961_v22 = vsub.f32 %v1530_v20, %v1556_v32  ;;  %v2963_v43 = vsub.f32 %v1529_v25, %v1558_v35  ;;  %v2968_v10 = vpack.c.bf16 %v1556_v32, %v1552_v11 }
 0x3e5   :  { %v1550_v33 = vsel %vm1549_vm6, %v1548_v38, 0  ;;  %v2977_v48 = vsub.f32 %v1544_v37, %v1568_v29  ;;  %v1643_v60 = vsub.f32 %v2941_v63, %v1642_v28  ;;  %v1649_v6 = vsub.f32 %v2955_v36, %v1648_v41 }
 0x3e6   :  { %v1660_v34 = vand.u32 4294901760, %v2963_v43  ;;  %v2971_v40 = vand.u32 4294901760, %v1550_v33  ;;  %v1654_v44 = vand.u32 4294901760, %v2961_v22  ;;  %2280 = vmatprep.subr.bf16.mxu1 %v2968_v10  ;;  %2316 = vmatprep.subr.bf16.mxu0 %v2968_v10  ;;  %v2998_v5 = vsub.f32 %v1543_v21, %v1570_v24 }
 0x3e7   :  { %v1538_v47 = vpop.permute.xlu1 %1537  ;;  %2282 = vmatpush1.bf16.msra.mxu1 %v2959_v42  ;;  %2318 = vmatpush1.bf16.msra.mxu0 %v2959_v42  ;;  %v1690_v7 = vand.u32 4294901760, %v2977_v48  ;;  %v1644_v11 = vand.u32 4294901760, %v1643_v60  ;;  %v1650_v25 = vand.u32 4294901760, %v1649_v6 }
 0x3e8   :  { %v2980_v49 = vsub.f32 %v1550_v33, %v2971_v40  ;;  %v1540_v53 = vsel %vm71_vm4, %v1534_v17, %v1538_v47  ;;  %v1542_v54 = vsel %vm71_vm4, %v1538_v47, %v1534_v17  ;;  %2284 = vmatprep.subr.bf16.mxu1 %v2912_v51  ;;  %v1661_v61 = vsub.f32 %v2963_v43, %v1660_v34 }
 0x3e9   :  { %v1545_v58 = vsel %vm71_vm4, %v1540_v53, 0.0  ;;  %v1546_v59 = vsel %vm2669_vm5, %v1542_v54, 0.0  ;;  %2320 = vmatprep.subr.bf16.mxu0 %v2912_v51  ;;  %v1655_v39 = vsub.f32 %v2961_v22, %v1654_v44  ;;  %v1696_v20 = vand.u32 4294901760, %v2998_v5 }
 0x3ea   :  { %v1631_v18 = vand.u32 4294901760, %v2980_v49  ;;  %v1572_v55 = vand.u32 4294901760, %v1546_v59  ;;  %v1574_v0 = vand.u32 4294901760, %v1545_v58  ;;  %v1662_v12 = vand.u32 4294901760, %v1661_v61 }
 0x3eb   :  { %2286 = vmatpush1.bf16.msra.mxu1 %v2901_v45  ;;  %2322 = vmatpush1.bf16.msra.mxu0 %v2901_v45  ;;  %v1656_v27 = vand.u32 4294901760, %v1655_v39  ;;  %v2327_v26 = vpack.c.bf16 %v1654_v44, %v1642_v28  ;;  %v1691_v35 = vsub.f32 %v2977_v48, %v1690_v7  ;;  %v2329_v38 = vpack.c.bf16 %v1660_v34, %v1648_v41 }
 0x3ec   :  { %v3002_v19 = vpack.c.bf16 %v1574_v0, %v1570_v24  ;;  %v3004_v57 = vsub.f32 %v1546_v59, %v1572_v55  ;;  %v3006_v23 = vsub.f32 %v1545_v58, %v1574_v0  ;;  %v1632_v8 = vsub.f32 %v2980_v49, %v1631_v18 }
 0x3ed   :  { %v2287_v9 = vpack.c.bf16 %v1572_v55, %v1568_v29  ;;  %v2291_v16 = vpack.c.bf16 %v1656_v27, %v1644_v11  ;;  %v2293_v17 = vpack.c.bf16 %v1662_v12, %v1650_v25  ;;  %v1697_v29 = vsub.f32 %v2998_v5, %v1696_v20  ;;  %v2465_v55 = vld [vmem:[#allocation5] sm:$0xff] }
 0x3ee   :  { %v1702_v14 = vand.u32 4294901760, %v3004_v57  ;;  %v1708_v15 = vand.u32 4294901760, %v3006_v23  ;;  %v1633_v32 = vand.u32 4294901760, %v1632_v8  ;;  %v1692_v28 = vand.u32 4294901760, %v1691_v35 }
 0x3ef   :  { %2288 = vmatprep.subr.bf16.mxu1 %v2287_v9  ;;  %2324 = vmatprep.subr.bf16.mxu0 %v2287_v9  ;;  %v1698_v24 = vand.u32 4294901760, %v1697_v29  ;;  %v2313_v13 = vpack.c.bf16 %v3006_v23, %v2998_v5  ;;  %v2554_v39 = vmov 101  }
 0x3f0   :  { %2290 = vmatpush1.bf16.msra.mxu1 %v3002_v19  ;;  %v1703_v31 = vsub.f32 %v3004_v57, %v1702_v14  ;;  %2326 = vmatpush1.bf16.msra.mxu0 %v3002_v19  ;;  %v1709_v37 = vsub.f32 %v3006_v23, %v1708_v15  ;;  %v2335_v34 = vpack.c.bf16 %v1702_v14, %v1690_v7 }
 0x3f1   :  { %2292 = vmatprep.subr.bf16.mxu1 %v2291_v16  ;;  %2328 = vmatprep.subr.bf16.mxu0 %v2327_v26  ;;  %v2337_v47 = vpack.c.bf16 %v1708_v15, %v1696_v20  ;;  %v2466_v16 = vld [vmem:[#allocation2] sm:$0xff] }
 0x3f2   :  { %v1704_v21 = vand.u32 4294901760, %v1703_v31  ;;  %v1710_v33 = vand.u32 4294901760, %v1709_v37  ;;  %v2467_v31 = vld [vmem:[#allocation2 + $0x8] sm:$0xff] }
 0x3f3   :  { %1634 = vmatmul.mubr.f32.vlgmr.msra.gmra.mrb[4].mxu1 %v1633_v32  ;;  %1949 = vmatmul.mubr.f32.vlgmr.msra.gmra.mrb[4].mxu0 %v1631_v18 }
 0x3f4   :  { %2294 = vmatpush1.bf16.msra.mxu1 %v2293_v17  ;;  %2330 = vmatpush1.bf16.msra.mxu0 %v2329_v38  ;;  %v2299_v44 = vpack.c.bf16 %v1704_v21, %v1692_v28  ;;  %v2301_v41 = vpack.c.bf16 %v1710_v33, %v1698_v24 }
 0x3f5   :  { %2296 = vmatprep.subr.bf16.mxu1 %v2931_v3  ;;  %2332 = vmatprep.subr.bf16.mxu0 %v2926_v62  ;;  %v2303_v3 = vpack.c.bf16 %v2961_v22, %v2941_v63  ;;  %v2305_v62 = vpack.c.bf16 %v2963_v43, %v2955_v36 }
 0x3f6   :  { %1764 = vmatprep.mubr.f32.mxu1 %v2546_v4  ;;  %2055 = vmatprep.mubr.f32.mxu0 %v2546_v4 }
 0x3f8   :  { %2298 = vmatpush1.bf16.msra.mxu1 %v2928_v1  ;;  %2334 = vmatpush1.bf16.msra.mxu0 %v2917_v56  ;;  %v2311_v56 = vpack.c.bf16 %v3004_v57, %v2977_v48  ;;  %v2553_v1 = vmov 100  }
 0x3f9   :  { %2300 = vmatprep.subr.bf16.mxu1 %v2299_v44  ;;  %2336 = vmatprep.subr.bf16.mxu0 %v2335_v34 }
 0x3fa   :  { %2426 = vset.pattern.permute.xlu1 %v2553_v1  ;;  %2425 = vset.pattern.permute.xlu0 %v2553_v1 }
 0x3fc   :  { %2302 = vmatpush1.bf16.msra.mxu1 %v2301_v41  ;;  %2338 = vmatpush1.bf16.msra.mxu0 %v2337_v47 }
 0x3fd   :  { %2304 = vmatprep.subr.bf16.mxu1 %v2303_v3  ;;  %2340 = vmatprep.subr.bf16.mxu0 %v2968_v10 }
 0x3ff   :  { %1766 = vmatmul.mubr.f32.vlgmr.msra.gmra.mrb[4].mxu1 %v2971_v40  ;;  %2057 = vmatmul.mubr.f32.vlgmr.msra.gmra.mrb[4].mxu0 %v2971_v40 }
 0x400   :  { %2306 = vmatpush1.bf16.msra.mxu1 %v2305_v62  ;;  %2342 = vmatpush1.bf16.msra.mxu0 %v2959_v42 }
 0x401   :  { %2308 = vmatprep.subr.bf16.mxu1 %v2307_v2  ;;  %2344 = vmatprep.subr.bf16.mxu0 %v2912_v51 }
 0x402   :  { %1860 = vmatprep.mubr.f32.mxu1 %v2546_v4  ;;  %2139 = vmatprep.mubr.f32.mxu0 %v2546_v4 }
 0x404   :  { %2310 = vmatpush1.bf16.msra.mxu1 %v2309_v50  ;;  %2346 = vmatpush1.bf16.msra.mxu0 %v2901_v45 }
 0x405   :  { %2312 = vmatprep.subr.bf16.mxu1 %v2311_v56  ;;  %2348 = vmatprep.subr.bf16.mxu0 %v2287_v9 }
 0x408   :  { %2314 = vmatpush1.bf16.msra.mxu1 %v2313_v13  ;;  %2350 = vmatpush1.bf16.msra.mxu0 %v3002_v19 }
 0x40b   :  { %1863 = vmatmul.mubr.f32.vlgmr.msra.gmra.mrb[4].mxu1 %v2980_v49  ;;  %2141 = vmatmul.mubr.f32.vlgmr.msra.gmra.mrb[4].mxu0 %v2971_v40 }
 0x4de   :  { %v1864_v51 = vpop.f32.mrb[4].mxu1  ;;  %v2142_v4 = vpop.f32.mrb[4].mxu0 }
 0x4df   :  { %v1866_v52 = vpop.f32.mrb[5].mxu1  ;;  %v2351_v2 = vadd.f32 %v2142_v4, %v1864_v51  ;;  %v2144_v30 = vpop.f32.mrb[5].mxu0 }
 0x4e0   :  { %v2352_v46 = vadd.f32 %v2144_v30, %v1866_v52 }
 0x4e1   :  { %2147 = vadd.xlane.f32.xlu1 %v2351_v2  ;;  %v2150_v50 = vmul.f32 %v2351_v2, %v2351_v2 }
 0x4e2   :  { %2177 = vadd.xlane.f32.xlu0 %v2352_v46  ;;  %v2180_v45 = vmul.f32 %v2352_v46, %v2352_v46 }
 0x4e5   :  { %2181 = vadd.xlane.f32.xlu1 %v2180_v45 }
 0x4e6   :  { %2151 = vadd.xlane.f32.xlu0 %v2150_v50 }
 0x56e   :  { %v2148_v63 = vpop.xlane.xlu1 %2147 }
 0x56f   :  { %v2178_v36 = vpop.xlane.xlu0 %2177  ;;  %v2149_v42 = vmul.f32 0.0078125, %v2148_v63 }
 0x570   :  { %v2179_v22 = vmul.f32 0.0078125, %v2178_v36 }
 0x571   :  { %v2154_v49 = vmul.f32 %v2149_v42, %v2149_v42 }
 0x572   :  { %v2184_v43 = vmul.f32 %v2179_v22, %v2179_v22  ;;  %v2182_v10 = vpop.xlane.xlu1 %2181 }
 0x573   :  { %v2183_v40 = vmul.f32 0.0078125, %v2182_v10  ;;  %v2152_v48 = vpop.xlane.xlu0 %2151 }
 0x574   :  { %v2153_v53 = vmul.f32 0.0078125, %v2152_v48 }
 0x575   :  { %v2185_v54 = vsub.f32 %v2183_v40, %v2184_v43 }
 0x576   :  { %v2155_v58 = vsub.f32 %v2153_v53, %v2154_v49 }
 0x577   :  { %v2186_v59 = vadd.f32 1e-05, %v2185_v54 }
 0x578   :  { %v2156_v60 = vadd.f32 1e-05, %v2155_v58 }
 0x579   :  { %2461 = vrsqrt.f32 %v2186_v59 }
 0x57a   :  { %2463 = vrsqrt.f32 %v2156_v60 }
 0x583   :  { %v2462_v61 = vpop.eup %2461 }
 0x584   :  { %v2464_v18 = vpop.eup %2463  ;;  %v2188_v0 = vmul.f32 %v2465_v55, %v2462_v61 }
 0x585   :  { %v2158_v6 = vmul.f32 %v2465_v55, %v2464_v18 }
 0x586   :  { %2191 = vperm.xlu1 %2426, %v2188_v0   ;;  %v2195_v7 = vmul.f32 %v2188_v0, %v2179_v22 }
 0x587   :  { %2161 = vperm.xlu0 %2425, %v2158_v6   ;;  %v2165_v5 = vmul.f32 %v2158_v6, %v2149_v42 }
 0x58a   :  { %2167 = vrot.lane.b32.xlu1 %v2165_v5, %s2545_s7 }
 0x58b   :  { %2427 = vset.pattern.permute.xlu1 %v2554_v39  ;;  %2428 = vset.pattern.permute.xlu0 %v2554_v39 }
 0x58e   :  { %2197 = vrot.lane.b32.xlu1 %v2195_v7, %s2545_s7 }
 0x605   :  { %v2192_v19 = vpop.permute.xlu1 %2191 }
 0x606   :  { %v2162_v11 = vpop.permute.xlu0 %2161  ;;  %v2194_v15 = vmul.f32 %v2352_v46, %v2192_v19 }
 0x607   :  { %v2164_v27 = vmul.f32 %v2351_v2, %v2162_v11 }
 0x609   :  { %v2168_v57 = vpop.permute.xlu1 %2167 }
 0x60a   :  { %v2170_v23 = vsub.f32 %v2465_v55, %v2168_v57 }
 0x60c   :  { %2173 = vperm.xlu1 %2427, %v2170_v23  }
 0x60d   :  { %v2198_v8 = vpop.permute.xlu1 %2197 }
 0x60e   :  { %v2200_v9 = vsub.f32 %v2465_v55, %v2198_v8 }
 0x610   :  { %2203 = vperm.xlu1 %2427, %v2200_v9  }
 0x68b   :  { %v2174_v12 = vpop.permute.xlu1 %2173 }
 0x68c   :  { %v2176_v14 = vadd.f32 %v2174_v12, %v2164_v27 }
 0x68e   :  { %v2207_v25 = vadd.f32 %v2466_v16, %v2176_v14 }
 0x68f   :  { %v2204_v20 = vpop.permute.xlu1 %2203 }
 0x690   :  { %2209 = vst [vmem:[#allocation7] sm:$0xff] %v2207_v25  ;;  %v2206_v26 = vadd.f32 %v2204_v20, %v2194_v15 }
 0x692   :  { %v2208_v32 = vadd.f32 %v2467_v31, %v2206_v26 }
 0x694   :  { %2210 = vst [vmem:[#allocation7 + $0x8] sm:$0xff] %v2208_v32 }
 0x695   :  { %2523 = shalt.err (!%p2520_p6)
}
 0x696   :  { %s2524_s14 = scalar_lea.hbm %s3067_s2, 256 }
 0x697   :  { %p2525_p7 = scmp.ne.s32.totalorder %s3067_s2, %s2524_s14  ;;  %p2528_p8 = scmp.lt.u32.totalorder %s2524_s14, %s3067_s2 }
 0x699   :  { %p2530_p9 = pnand %p2528_p8, %p2525_p7 }
 0x69b   :  { %2533 = shalt.err (!%p2530_p9)
}
 0x69c   :  { %2220 = dma.vmem_to_hbm [thread:$0]  %s2218_s10, 256, %s3067_s2, [#allocation4]  }
 0x69d   :  { %2538 = dma.done.wait [#allocation4], 256  }
 0x69e   :  { %2539 = vsyncadd [#allocation4], 4294967040 }
 0x69f   :  { %2224 = vsyncpa [#allocation3], 1 }
 0x6a0   :  { %2225 = vsyncpa [#allocation6], 1 }
 0x6a1   :  { %2226 = vsyncpa [#allocation4], 1 }

</bundles_post_ra>
